<compile_context>
chip_gen: v7x
topology: tpu7x:2x2x1
jax: 0.10.0
libtpu: 0.0.40
codegen_flags: <defaults>
</compile_context>

<pallas_src>
import functools

import jax
import jax.numpy as jnp
from jax.experimental import pallas as pl
from jax.experimental.pallas import tpu as pltpu


# ----------------------------- module hyper-params ---------------------------
NUM_EMBEDDINGS = 64      # K
EMBEDDING_DIM = 32       # D
COMMITMENT_COST = 0.25
ENTROPY_WEIGHT = 1.0
DIVERSITY_WEIGHT = 1.0
KL_WEIGHT = 0.0          # disabled in module defaults -> skipped (matches `if klweight > 0`)
JS_WEIGHT = 0.0          # disabled


def _round_up(a, b):
    return (a + b - 1) // b * b


# --------------------------------- kernel ------------------------------------
def _vq_kernel(x_ref, e_ref, e2h_ref, q_ref, st_ref, *, n_valid):
    """One N-tile of the VQ forward (natural (T, D) layout).

    x_ref   : (T, D)         streamed input tile                     (VMEM)
    e_ref   : (K, D)         resident codebook                       (VMEM)
    e2h_ref : (1, K)         resident 0.5*|e|^2, f32                 (VMEM)
    q_ref   : (T, D)         quantized output tile                   (VMEM)
    st_ref  : (1, 1, W>=K+1) merged per-tile stats, f32:             (VMEM)
                             lanes 0..K-1 = per-code counts,
                             lanes K..W-1 = sum((q - x)^2) replicated
    """
    x_in = x_ref[...]                                   # (T, D), native dtype -> MXU
    e_in = e_ref[...]                                   # (K, D), native dtype -> MXU
    e2h = e2h_ref[...]                                  # (1, K) f32
    t = x_in.shape[0]
    k = e_in.shape[0]

    # half-distances: 0.5*|e|^2 - x.e   (|x|^2 dropped: per-row constant)
    xe = jax.lax.dot_general(x_in, e_in, (((1,), (1,)), ((), ())),
                             preferred_element_type=jnp.float32)    # (T, K)
    dist = e2h - xe                                                 # (T, K) f32

    # argmin over the codebook (lane) axis, first index on ties
    # (matches torch.argmin semantics)
    iota_k = jax.lax.broadcasted_iota(jnp.int32, (t, k), 1)
    min_d = jnp.min(dist, axis=1, keepdims=True)                    # (T, 1)
    idx = jnp.min(jnp.where(dist == min_d, iota_k, k),
                  axis=1, keepdims=True)                            # (T, 1)
    enc_f32 = (iota_k == idx).astype(jnp.float32)                   # (T, K)

    # quantized = enc @ E : keep the MXU operands in the codebook dtype
    # (bf16 stays bf16; enc is exact 0/1 so the cast is lossless)
    q = jax.lax.dot_general(enc_f32.astype(e_in.dtype), e_in,
                            (((1,), (0,)), ((), ())),
                            preferred_element_type=jnp.float32)     # (T, D) f32
    q_ref[...] = q.astype(q_ref.dtype)

    # validity mask for the (possibly padded) last tile; mask BEFORE squaring
    row = pl.program_id(0) * t + jax.lax.broadcasted_iota(jnp.int32, (t, 1), 0)
    valid = row < n_valid                                           # (T, 1) bool

    diff = jnp.where(valid, q - x_in.astype(jnp.float32), 0.0)      # (T, D)
    sq = jnp.sum(diff * diff)                                       # scalar f32

    counts = jnp.sum(jnp.where(valid, enc_f32, 0.0),
                     axis=0, keepdims=True)                         # (1, K)

    stat_w = st_ref.shape[-1]
    sq_lanes = jnp.zeros((1, stat_w - k), jnp.float32) + sq         # replicate sum-sq
    st_ref[...] = jnp.concatenate([counts, sq_lanes],
                                  axis=1).reshape(1, 1, stat_w)


# --------------------------------- wrapper ------------------------------------
def vector_quantizer_ema_forward(x, embeddings, *,
                                 commitment_cost=COMMITMENT_COST,
                                 entropy_weight=ENTROPY_WEIGHT,
                                 diversity_weight=DIVERSITY_WEIGHT,
                                 max_tile_n=8192,
                                 vmem_limit_bytes=48 * 1024 * 1024):
    """x: (B, H, W, D) channels-last, embeddings: (K, D). Returns (quantized, total_loss)."""
    orig_shape = x.shape
    k, d = embeddings.shape
    flat_x = x.reshape(-1, d)                 # view-like reshape, no transpose
    n = flat_x.shape[0]

    # Tile-aware tiling: balance tiles so the padded tail is (near-)empty and
    # keep >= 2 tiles for large inputs (megacore sharding on v7x).
    min_tiles = 2 if n >= 2048 else 1
    num_tiles = max(pl.cdiv(n, int(max_tile_n)), min_tiles)
    tile_n = _round_up(pl.cdiv(n, num_tiles), 8)
    num_tiles = pl.cdiv(n, tile_n)
    n_pad = num_tiles * tile_n

    # explicit pad only when N is not already tileable (rare with the above)
    x_in = flat_x if n_pad == n else jnp.pad(flat_x, ((0, n_pad - n), (0, 0)))

    # 0.5*|e|^2 precomputed once (hoisted; -2 factor folded away)
    e2_half = 0.5 * jnp.sum(embeddings.astype(jnp.float32) ** 2,
                            axis=1).reshape(1, k)

    stat_w = _round_up(k + 1, 128)            # lane-dense merged stats width
    kernel = functools.partial(_vq_kernel, n_valid=n)

    q_flat, stats = pl.pallas_call(
        kernel,
        grid=(num_tiles,),
        in_specs=[
            pl.BlockSpec((tile_n, d), lambda i: (i, 0)),    # streamed x tile
            pl.BlockSpec((k, d), lambda i: (0, 0)),         # resident codebook
            pl.BlockSpec((1, k), lambda i: (0, 0)),         # resident 0.5*|e|^2
        ],
        out_specs=(
            pl.BlockSpec((tile_n, d), lambda i: (i, 0)),    # quantized tile
            pl.BlockSpec((1, 1, stat_w), lambda i: (i, 0, 0)),  # merged stats
        ),
        out_shape=(
            jax.ShapeDtypeStruct((n_pad, d), x.dtype),
            jax.ShapeDtypeStruct((num_tiles, 1, stat_w), jnp.float32),
        ),
        compiler_params=pltpu.CompilerParams(
            dimension_semantics=("parallel",),
            vmem_limit_bytes=int(vmem_limit_bytes),
        ),
    )(x_in, embeddings, e2_half)

    # back to channels-last; no transpose, slice only if a padded tail exists
    q_flat = q_flat if n_pad == n else q_flat[:n]
    quantized = q_flat.reshape(orig_shape)

    # finalize global statistics once (nonlinear in p -> must not be per-tile)
    counts = jnp.sum(stats[:, 0, :k], axis=0)                  # (K,)
    sum_sq = jnp.sum(stats[:, 0, k])                           # scalar
    mse = sum_sq / jnp.float32(n * d)
    # e_latent_loss == q_latent_loss in forward value (detach only affects grads)
    loss = (1.0 + commitment_cost) * mse
    p = counts / jnp.float32(n)
    entropy_reg = -jnp.sum(p * jnp.log(p + 1e-10))
    diversity_reg = jnp.sum((p - 1.0 / jnp.float32(k)) ** 2)
    total_loss = (loss
                  - entropy_weight * entropy_reg
                  + diversity_weight * diversity_reg)
    return quantized, total_loss


# ------------------------------ pure JAX reference ----------------------------
def _reference(x, embeddings):
    k, d = embeddings.shape
    flat_x = x.reshape(-1, d).astype(jnp.float32)
    e = embeddings.astype(jnp.float32)
    dist = (jnp.sum(flat_x ** 2, axis=1, keepdims=True)
            + jnp.sum(e ** 2, axis=1)
            - 2.0 * flat_x @ e.T)
    idx = jnp.argmin(dist, axis=1)
    enc = jax.nn.one_hot(idx, k, dtype=jnp.float32)
    q = enc @ e
    mse = jnp.mean((q - flat_x) ** 2)
    loss = (1.0 + COMMITMENT_COST) * mse
    p = enc.mean(axis=0)
    entropy = -jnp.sum(p * jnp.log(p + 1e-10))
    diversity = jnp.sum((p - 1.0 / k) ** 2)
    total = loss - ENTROPY_WEIGHT * entropy + DIVERSITY_WEIGHT * diversity
    return q.reshape(x.shape), total


# ----------------------------------- main -------------------------------------
if __name__ == "__main__":
    key = jax.random.PRNGKey(0)
    k_emb, k_x, k_x2 = jax.random.split(key, 3)

    # deterministic codebook init, matching uniform_(-1/K, 1/K)
    embeddings = jax.random.uniform(
        k_emb, (NUM_EMBEDDINGS, EMBEDDING_DIM), dtype=jnp.float32,
        minval=-1.0 / NUM_EMBEDDINGS, maxval=1.0 / NUM_EMBEDDINGS)

    # small channels-last activation (B, H, W, D), D == embedding_dim
    x = jax.random.normal(k_x, (2, 8, 8, EMBEDDING_DIM), dtype=jnp.float32)

    quantized, total_loss = vector_quantizer_ema_forward(x, embeddings)
    jax.block_until_ready((quantized, total_loss))

    q_ref, loss_ref = _reference(x, embeddings)
    assert jnp.allclose(quantized, q_ref, atol=1e-5, rtol=1e-5)
    assert jnp.allclose(total_loss, loss_ref, atol=1e-4, rtol=1e-4)

    # exercise the multi-tile + padded/masked-tail path: N = 2*9*15 = 270,
    # max_tile_n=128 -> 3 tiles of 96 rows, last 18 rows of the pad are masked.
    x2 = jax.random.normal(k_x2, (2, 9, 15, EMBEDDING_DIM), dtype=jnp.float32)
    q2, l2 = vector_quantizer_ema_forward(x2, embeddings, max_tile_n=128)
    jax.block_until_ready((q2, l2))
    q2_ref, l2_ref = _reference(x2, embeddings)
    assert jnp.allclose(q2, q2_ref, atol=1e-5, rtol=1e-5)
    assert jnp.allclose(l2, l2_ref, atol=1e-4, rtol=1e-4)

    # bf16 path: MXU is fed bf16 operands directly (no f32 upcast); sanity run
    # only (bf16 rounding can legitimately flip near-tie code assignments).
    qb, lb = vector_quantizer_ema_forward(
        x2.astype(jnp.bfloat16), embeddings.astype(jnp.bfloat16), max_tile_n=128)
    jax.block_until_ready((qb, lb))
    assert qb.dtype == jnp.bfloat16 and qb.shape == x2.shape
    assert bool(jnp.isfinite(lb))

    print("KERNEL_OK")
</pallas_src>

<mosaic_0001>
module attributes {stable_mosaic.version = 11 : i64} {
  func.func @_vq_kernel(%arg0: i32, %arg1: memref<128x32xf32, #tpu.memory_space<vmem>>, %arg2: memref<64x32xf32, #tpu.memory_space<vmem>>, %arg3: memref<1x64xf32, #tpu.memory_space<vmem>>, %arg4: memref<128x32xf32, #tpu.memory_space<vmem>>, %arg5: memref<1x1x128xf32, #tpu.memory_space<vmem>>) attributes {dimension_semantics = [#tpu.dimension_semantics<parallel>], iteration_bounds = array<i64: 1>, scalar_prefetch = 0 : i64, scratch_operands = 0 : i64, tpu.core_type = #tpu.core_type<tc>, window_params = [{transform_indices = @transform_0, window_bounds = array<i64: 128, 32>}, {pipeline_mode = #tpu.pipeline_mode<synchronous>, transform_indices = @transform_1, window_bounds = array<i64: 64, 32>}, {pipeline_mode = #tpu.pipeline_mode<synchronous>, transform_indices = @transform_2, window_bounds = array<i64: 1, 64>}, {transform_indices = @transform_3, window_bounds = array<i64: 128, 32>}, {transform_indices = @transform_4, window_bounds = array<i64: 1, 1, 128>}]} {
    %c0 = arith.constant 0 : index
    %c0_0 = arith.constant 0 : index
    %0 = vector.load %arg1[%c0, %c0_0] : memref<128x32xf32, #tpu.memory_space<vmem>>, vector<128x32xf32>
    %c0_1 = arith.constant 0 : index
    %c0_2 = arith.constant 0 : index
    %1 = vector.load %arg2[%c0_1, %c0_2] : memref<64x32xf32, #tpu.memory_space<vmem>>, vector<64x32xf32>
    %c0_3 = arith.constant 0 : index
    %c0_4 = arith.constant 0 : index
    %2 = vector.load %arg3[%c0_3, %c0_4] : memref<1x64xf32, #tpu.memory_space<vmem>>, vector<1x64xf32>
    %cst = arith.constant dense<0.000000e+00> : vector<128x64xf32>
    %3 = tpu.matmul %0, %1, %cst {dimension_numbers = #tpu.dot_dimension_numbers<[1], [1], [0], [0], [0, 0, 1, 0], [], []>} : vector<128x32xf32>, vector<64x32xf32>, vector<128x64xf32> -> vector<128x64xf32>
    %4 = vector.broadcast %2 : vector<1x64xf32> to vector<128x64xf32>
    %5 = arith.subf %4, %3 : vector<128x64xf32>
    %6 = tpu.iota {dimensions = array<i32: 1>} : vector<128x64xi32>
    %cst_5 = arith.constant dense<0x7F800000> : vector<128xf32>
    %7 = vector.multi_reduction <minimumf>, %5, %cst_5 [1] : vector<128x64xf32> to vector<128xf32>
    %8 = vector.shape_cast %7 : vector<128xf32> to vector<128x1xf32>
    %9 = vector.broadcast %8 : vector<128x1xf32> to vector<128x64xf32>
    %10 = arith.cmpf oeq, %5, %9 : vector<128x64xf32>
    %c64_i32 = arith.constant 64 : i32
    %11 = vector.broadcast %c64_i32 : i32 to vector<128x64xi32>
    %12 = arith.select %10, %6, %11 : vector<128x64xi1>, vector<128x64xi32>
    %cst_6 = arith.constant dense<2147483647> : vector<128xi32>
    %13 = vector.multi_reduction <minsi>, %12, %cst_6 [1] : vector<128x64xi32> to vector<128xi32>
    %14 = vector.shape_cast %13 : vector<128xi32> to vector<128x1xi32>
    %15 = vector.broadcast %14 : vector<128x1xi32> to vector<128x64xi32>
    %16 = arith.cmpi eq, %6, %15 : vector<128x64xi32>
    %17 = arith.extui %16 : vector<128x64xi1> to vector<128x64xi32>
    %18 = arith.sitofp %17 : vector<128x64xi32> to vector<128x64xf32>
    %cst_7 = arith.constant dense<0.000000e+00> : vector<128x32xf32>
    %19 = tpu.matmul %18, %1, %cst_7 {dimension_numbers = #tpu.dot_dimension_numbers<[1], [0], [0], [1], [0, 0, 1, 1], [], []>} : vector<128x64xf32>, vector<64x32xf32>, vector<128x32xf32> -> vector<128x32xf32>
    %c0_8 = arith.constant 0 : index
    %c0_9 = arith.constant 0 : index
    %20 = vector.load %arg4[%c0_8, %c0_9] : memref<128x32xf32, #tpu.memory_space<vmem>>, vector<128x32xf32>
    tpu.vector_store %arg4[%c0_8, %c0_9], %19 {strides = array<i32>} : memref<128x32xf32, #tpu.memory_space<vmem>>, vector<128x32xf32>,
    %c128_i32 = arith.constant 128 : i32
    %21 = arith.muli %arg0, %c128_i32 : i32
    %22 = tpu.iota {dimensions = array<i32: 0>} : vector<128x1xi32>
    %23 = vector.broadcast %21 : i32 to vector<128x1xi32>
    %24 = arith.addi %23, %22 : vector<128x1xi32>
    %c128_i32_10 = arith.constant 128 : i32
    %25 = vector.broadcast %c128_i32_10 : i32 to vector<128x1xi32>
    %26 = arith.cmpi slt, %24, %25 : vector<128x1xi32>
    %27 = arith.subf %19, %0 : vector<128x32xf32>
    %cst_11 = arith.constant 0.000000e+00 : f32
    %28 = vector.shape_cast %26 : vector<128x1xi1> to vector<128x1xi1>
    %29 = vector.broadcast %28 : vector<128x1xi1> to vector<128x32xi1>
    %30 = vector.broadcast %cst_11 : f32 to vector<128x32xf32>
    %31 = arith.select %29, %27, %30 : vector<128x32xi1>, vector<128x32xf32>
    %32 = arith.mulf %31, %31 : vector<128x32xf32>
    %33 = vector.shape_cast %32 : vector<128x32xf32> to vector<1x128x32xf32>
    %cst_12 = arith.constant dense<0.000000e+00> : vector<1xf32>
    %34 = vector.multi_reduction <add>, %33, %cst_12 [1, 2] : vector<1x128x32xf32> to vector<1xf32>
    %35 = vector.shape_cast %34 : vector<1xf32> to vector<1x1x1xf32>
    %36 = vector.extract %35[0, 0, 0] : f32 from vector<1x1x1xf32>
    %cst_13 = arith.constant 0.000000e+00 : f32
    %37 = vector.shape_cast %26 : vector<128x1xi1> to vector<128x1xi1>
    %38 = vector.broadcast %37 : vector<128x1xi1> to vector<128x64xi1>
    %39 = vector.broadcast %cst_13 : f32 to vector<128x64xf32>
    %40 = arith.select %38, %18, %39 : vector<128x64xi1>, vector<128x64xf32>
    %cst_14 = arith.constant dense<0.000000e+00> : vector<64xf32>
    %41 = vector.multi_reduction <add>, %40, %cst_14 [0] : vector<128x64xf32> to vector<64xf32>
    %42 = vector.shape_cast %41 : vector<64xf32> to vector<1x64xf32>
    %cst_15 = arith.constant 0.000000e+00 : f32
    %43 = vector.broadcast %cst_15 : f32 to vector<1x64xf32>
    %44 = vector.broadcast %36 : f32 to vector<1x64xf32>
    %45 = arith.addf %43, %44 : vector<1x64xf32>
    %46 = tpu.concatenate %42, %45 in 1 : vector<1x64xf32>, vector<1x64xf32> -> vector<1x128xf32>
    %47 = vector.shape_cast %46 : vector<1x128xf32> to vector<1x1x128xf32>
    %c0_16 = arith.constant 0 : index
    %c0_17 = arith.constant 0 : index
    %c0_18 = arith.constant 0 : index
    %48 = vector.load %arg5[%c0_16, %c0_17, %c0_18] : memref<1x1x128xf32, #tpu.memory_space<vmem>>, vector<1x1x128xf32>
    tpu.vector_store %arg5[%c0_16, %c0_17, %c0_18], %47 {strides = array<i32>} : memref<1x1x128xf32, #tpu.memory_space<vmem>>, vector<1x1x128xf32>,
    return
  }
  func.func @transform_0(%arg0: i32) -> (i32, i32) {
    %c0_i32 = arith.constant 0 : i32
    %c0_i32_0 = arith.constant 0 : i32
    return %arg0, %c0_i32 : i32, i32
  }
  func.func @transform_1(%arg0: i32) -> (i32, i32) {
    %c0_i32 = arith.constant 0 : i32
    %c0_i32_0 = arith.constant 0 : i32
    %c0_i32_1 = arith.constant 0 : i32
    return %c0_i32, %c0_i32_0 : i32, i32
  }
  func.func @transform_2(%arg0: i32) -> (i32, i32) {
    %c0_i32 = arith.constant 0 : i32
    %c0_i32_0 = arith.constant 0 : i32
    %c0_i32_1 = arith.constant 0 : i32
    return %c0_i32, %c0_i32_0 : i32, i32
  }
  func.func @transform_3(%arg0: i32) -> (i32, i32) {
    %c0_i32 = arith.constant 0 : i32
    %c0_i32_0 = arith.constant 0 : i32
    return %arg0, %c0_i32 : i32, i32
  }
  func.func @transform_4(%arg0: i32) -> (i32, i32, i32) {
    %c0_i32 = arith.constant 0 : i32
    %c0_i32_0 = arith.constant 0 : i32
    %c0_i32_1 = arith.constant 0 : i32
    return %arg0, %c0_i32, %c0_i32_0 : i32, i32, i32
  }
}

</mosaic_0001>

<bundles_post_ra>
// kernel: tpu_custom_call.1
= control target key start
LH: loop header
LB: loop body
LE: loop exit
PB: predicated region body
PF: predicated region fallthrough
CT: control target
= control target key end

     0   :  { %vm42_vm0 = vcmask 261120   ;;  %s2032_s0 = inlined_call_operand.vmem [shape: f32[128,32], index: 0, kind: input, shape index: {}]   ;;  %s2033_s1 = inlined_call_operand.vmem [shape: f32[64,32], index: 1, kind: input, shape index: {}]   ;;  %s2034_s2 = inlined_call_operand.vmem [shape: f32[1,64], index: 2, kind: input, shape index: {}]   ;;  %s2035_s3 = inlined_call_operand.vmem [shape: f32[128,32], index: 3, kind: output, shape index: {0}]   ;;  %s2036_s4 = inlined_call_operand.hbm [shape: f32[1,1,128], index: 4, kind: output, shape index: {1}]  }
   0x1   :  { %v33_v0 = vld [vmem:[%s2033_s1] sm:$0xff]  ;;  %v34_v1 = vld [vmem:[%s2033_s1 + $0x8] sm:$0xff]  ;;  %v35_v2 = vld [vmem:[%s2033_s1 + $0x10] sm:$0xff] }
   0x2   :  { %v1293_v3 = vpack.c.bf16 %v34_v1, %v33_v0  ;;  %vm1402_vm1 = vmpackc.low %vm42_vm0, %vm42_vm0  ;;  %v36_v5 = vld [vmem:[%s2033_s1 + $0x18] sm:$0xff]  ;;  %v1414_v7 = vld [vmem:[%s2032_s0] sm:$0xff] }
   0x3   :  { %v1299_v6 = vpack.c.bf16 %v36_v5, %v35_v2  ;;  %1229 = vmatprep.mubr.msk.f32.mxu0 %vm42_vm0, %v1414_v7  ;;  %v37_v8 = vld [vmem:[%s2033_s1 + $0x20] sm:$0xff]  ;;  %v38_v9 = vld [vmem:[%s2033_s1 + $0x28] sm:$0xff] }
   0x4   :  { %1295 = vmatprep.subr.msk.bf16.mxu0 %vm1402_vm1, %v1293_v3  ;;  %1318 = vmatprep.subr.bf16.mxu1 %v1293_v3  ;;  %v1305_v10 = vpack.c.bf16 %v38_v9, %v37_v8 }
   0x5   :  { %1298 = vmatpush3.bf16.xpose.msk.msra.mxu0 %vm1402_vm1, %v1293_v3  ;;  %1320 = vmatpush3.bf16.msra.mxu1 %v1293_v3 }
   0x6   :  { %1301 = vmatprep.subr.msk.bf16.mxu0 %vm1402_vm1, %v1299_v6  ;;  %1322 = vmatprep.subr.bf16.mxu1 %v1299_v6 }
   0x7   :  { %10 = vsyncpa [#allocation3], 0  ;;  %v39_v11 = vld [vmem:[%s2033_s1 + $0x30] sm:$0xff]  ;;  %v40_v12 = vld [vmem:[%s2033_s1 + $0x38] sm:$0xff]  ;;  %vm284_vm2 = vcmask 523264  }
   0x8   :  { %v1311_v13 = vpack.c.bf16 %v40_v12, %v39_v11  ;;  %v1447_v14 = vld [vmem:[%s2032_s0 + $0x8] sm:$0xff]  ;;  %v1452_v15 = vld [vmem:[%s2032_s0 + $0x10] sm:$0xff]  ;;  %v1461_v16 = vld [vmem:[%s2032_s0 + $0x18] sm:$0xff] }
   0x9   :  { %1324 = vmatpush3.bf16.msra.mxu1 %v1299_v6  ;;  %v1466_v17 = vld [vmem:[%s2032_s0 + $0x20] sm:$0xff]  ;;  %v1475_v18 = vld [vmem:[%s2032_s0 + $0x28] sm:$0xff]  ;;  %v1480_v19 = vld [vmem:[%s2032_s0 + $0x30] sm:$0xff] }
   0xa   :  { %1326 = vmatprep.subr.bf16.mxu1 %v1305_v10  ;;  %v1489_v20 = vld [vmem:[%s2032_s0 + $0x38] sm:$0xff]  ;;  %v1494_v21 = vld [vmem:[%s2032_s0 + $0x40] sm:$0xff]  ;;  %v1503_v22 = vld [vmem:[%s2032_s0 + $0x48] sm:$0xff] }
   0xb   :  { %v1508_v23 = vld [vmem:[%s2032_s0 + $0x50] sm:$0xff]  ;;  %v1517_v24 = vld [vmem:[%s2032_s0 + $0x58] sm:$0xff]  ;;  %v29_v25 = vld [vmem:[%s2032_s0 + $0x60] sm:$0xff] }
   0xc   :  { %v1528_v26 = vld [vmem:[%s2032_s0 + $0x68] sm:$0xff]  ;;  %v31_v27 = vld [vmem:[%s2032_s0 + $0x70] sm:$0xff]  ;;  %v32_v28 = vld [vmem:[%s2032_s0 + $0x78] sm:$0xff] }
   0xd   :  { %1304 = vmatpush3.bf16.xpose.msk.msra.mxu0 %vm1402_vm1, %v1299_v6  ;;  %1328 = vmatpush3.bf16.msra.mxu1 %v1305_v10  ;;  %v1132_v29 = vld [vmem:[%s2034_s2] ss:$0 sm:$0xff] }
   0xe   :  { %1307 = vmatprep.subr.msk.bf16.mxu0 %vm1402_vm1, %v1305_v10  ;;  %1330 = vmatprep.subr.bf16.mxu1 %v1311_v13 }
  0x11   :  { %1332 = vmatpush3.bf16.msra.mxu1 %v1311_v13 }
  0x15   :  { %1310 = vmatpush3.bf16.xpose.msk.msra.mxu0 %vm1402_vm1, %v1305_v10 }
  0x16   :  { %1313 = vmatprep.subr.msk.bf16.mxu0 %vm1402_vm1, %v1311_v13 }
  0x1d   :  { %1316 = vmatpush3.bf16.xpose.msk.msra.mxu0 %vm1402_vm1, %v1311_v13 }
  0x24   :  { %1230 = vmatmul.mubr.msk.f32.vlgmr.msra.gmra.mrb[0].mxu0 %vm42_vm0, %v1447_v14 }
  0x25   :  { %1232 = vmatprep.mubr.msk.f32.mxu0 %vm42_vm0, %v1452_v15 }
  0x28   :  { %1233 = vmatmul.mubr.msk.f32.gmra.mrb[2].mxu0 %vm42_vm0, %v1461_v16 }
  0x29   :  { %1235 = vmatprep.mubr.msk.f32.mxu0 %vm42_vm0, %v1466_v17 }
  0x2c   :  { %1236 = vmatmul.mubr.msk.f32.gmra.mrb[4].mxu0 %vm42_vm0, %v1475_v18 }
  0x2d   :  { %1238 = vmatprep.mubr.msk.f32.mxu0 %vm42_vm0, %v1480_v19 }
  0x30   :  { %1239 = vmatmul.mubr.msk.f32.gmra.mrb[6].mxu0 %vm42_vm0, %v1489_v20 }
  0x31   :  { %1241 = vmatprep.mubr.msk.f32.mxu0 %vm42_vm0, %v1494_v21 }
  0x34   :  { %1242 = vmatmul.mubr.msk.f32.gmra.mrb[8].mxu0 %vm42_vm0, %v1503_v22 }
  0x35   :  { %1244 = vmatprep.mubr.msk.f32.mxu0 %vm42_vm0, %v1508_v23 }
  0x38   :  { %1245 = vmatmul.mubr.msk.f32.gmra.mrb[10].mxu0 %vm42_vm0, %v1517_v24 }
  0x39   :  { %1247 = vmatprep.mubr.msk.f32.mxu0 %vm42_vm0, %v29_v25 }
  0x3c   :  { %1248 = vmatmul.mubr.msk.f32.gmra.mrb[12].mxu0 %vm42_vm0, %v1528_v26 }
  0x3d   :  { %1250 = vmatprep.mubr.msk.f32.mxu0 %vm42_vm0, %v31_v27  ;;  %v282_v27 = vlaneseq }
  0x40   :  { %1251 = vmatmul.mubr.msk.f32.gmra.mrb[14].mxu0 %vm42_vm0, %v32_v28  ;;  %v1607_v28 = vand.u32 127, %v282_v27 }
  0xf7   :  { %v1231_v30 = vpop.f32.mrb[0].mxu0 }
  0xf8   :  { %v181_v31 = vpop.f32.mrb[1].mxu0  ;;  %v1545_v33 = vsub.f32 %v1132_v29, %v1231_v30 }
  0xf9   :  { %v1543_v32 = vsub.f32 %v1132_v29, %v181_v31 }
  0xfa   :  { %v288_v40 = vsel %vm284_vm2, %v1545_v33, inf }
  0xfb   :  { %v1234_v34 = vpop.f32.mrb[2].mxu0  ;;  %v285_v35 = vsel %vm284_vm2, %v1543_v32, inf }
  0xfc   :  { %286 = vmin.xlane.f32.xlu0 %v285_v35  ;;  %v191_v36 = vpop.f32.mrb[3].mxu0  ;;  %v1551_v38 = vsub.f32 %v1132_v29, %v1234_v34 }
  0xfd   :  { %v1549_v37 = vsub.f32 %v1132_v29, %v191_v36 }
  0xfe   :  { %v294_v46 = vsel %vm284_vm2, %v1551_v38, inf }
  0xff   :  { %v1237_v39 = vpop.f32.mrb[4].mxu0  ;;  %v291_v41 = vsel %vm284_vm2, %v1549_v37, inf }
 0x100   :  { %289 = vmin.xlane.f32.xlu0 %v288_v40  ;;  %292 = vmin.xlane.f32.xlu1 %v291_v41  ;;  %v201_v42 = vpop.f32.mrb[5].mxu0  ;;  %v1559_v44 = vsub.f32 %v1132_v29, %v1237_v39 }
 0x101   :  { %v1557_v43 = vsub.f32 %v1132_v29, %v201_v42 }
 0x102   :  { %v300_v52 = vsel %vm284_vm2, %v1559_v44, inf }
 0x103   :  { %v1240_v45 = vpop.f32.mrb[6].mxu0  ;;  %v297_v47 = vsel %vm284_vm2, %v1557_v43, inf }
 0x104   :  { %295 = vmin.xlane.f32.xlu1 %v294_v46  ;;  %298 = vmin.xlane.f32.xlu0 %v297_v47  ;;  %v211_v48 = vpop.f32.mrb[7].mxu0  ;;  %v1567_v50 = vsub.f32 %v1132_v29, %v1240_v45 }
 0x105   :  { %v1565_v49 = vsub.f32 %v1132_v29, %v211_v48 }
 0x106   :  { %v306_v58 = vsel %vm284_vm2, %v1567_v50, inf }
 0x107   :  { %v1243_v51 = vpop.f32.mrb[8].mxu0  ;;  %v303_v53 = vsel %vm284_vm2, %v1565_v49, inf }
 0x108   :  { %301 = vmin.xlane.f32.xlu1 %v300_v52  ;;  %304 = vmin.xlane.f32.xlu0 %v303_v53  ;;  %v221_v54 = vpop.f32.mrb[9].mxu0  ;;  %v1575_v56 = vsub.f32 %v1132_v29, %v1243_v51 }
 0x109   :  { %v1573_v55 = vsub.f32 %v1132_v29, %v221_v54 }
 0x10a   :  { %v312_v0 = vsel %vm284_vm2, %v1575_v56, inf }
 0x10b   :  { %v1246_v57 = vpop.f32.mrb[10].mxu0  ;;  %v309_v59 = vsel %vm284_vm2, %v1573_v55, inf }
 0x10c   :  { %307 = vmin.xlane.f32.xlu1 %v306_v58  ;;  %310 = vmin.xlane.f32.xlu0 %v309_v59  ;;  %v231_v60 = vpop.f32.mrb[11].mxu0  ;;  %v1583_v62 = vsub.f32 %v1132_v29, %v1246_v57 }
 0x10d   :  { %v1581_v61 = vsub.f32 %v1132_v29, %v231_v60 }
 0x10e   :  { %v318_v6 = vsel %vm284_vm2, %v1583_v62, inf }
 0x10f   :  { %v1249_v63 = vpop.f32.mrb[12].mxu0  ;;  %v315_v1 = vsel %vm284_vm2, %v1581_v61, inf }
 0x110   :  { %313 = vmin.xlane.f32.xlu1 %v312_v0  ;;  %316 = vmin.xlane.f32.xlu0 %v315_v1  ;;  %v241_v2 = vpop.f32.mrb[13].mxu0  ;;  %v1591_v4 = vsub.f32 %v1132_v29, %v1249_v63 }
 0x111   :  { %v1589_v3 = vsub.f32 %v1132_v29, %v241_v2 }
 0x112   :  { %v324_v12 = vsel %vm284_vm2, %v1591_v4, inf }
 0x113   :  { %v1252_v5 = vpop.f32.mrb[14].mxu0  ;;  %v321_v8 = vsel %vm284_vm2, %v1589_v3, inf }
 0x114   :  { %319 = vmin.xlane.f32.xlu1 %v318_v6  ;;  %322 = vmin.xlane.f32.xlu0 %v321_v8  ;;  %v251_v9 = vpop.f32.mrb[15].mxu0  ;;  %v1599_v11 = vsub.f32 %v1132_v29, %v1252_v5 }
 0x115   :  { %v1597_v10 = vsub.f32 %v1132_v29, %v251_v9 }
 0x116   :  { %v330_v25 = vsel %vm284_vm2, %v1599_v11, inf }
 0x117   :  { %v327_v13 = vsel %vm284_vm2, %v1597_v10, inf }
 0x118   :  { %325 = vmin.xlane.f32.xlu1 %v324_v12  ;;  %328 = vmin.xlane.f32.xlu0 %v327_v13 }
 0x11c   :  { %331 = vmin.xlane.f32.xlu1 %v330_v25 }
 0x189   :  { %v287_v30 = vpop.xlane.xlu0 %286 }
 0x18a   :  { %vm333_vm3 = vcmp.eq.f32.partialorder %v1543_v32, %v287_v30 }
 0x18b   :  { %v349_v29 = vsel %vm333_vm3, %v1607_v28, 64 }
 0x18c   :  { %v1612_v31 = vsel %vm284_vm2, %v349_v29, 2147483647 }
 0x18d   :  { %v290_v34 = vpop.xlane.xlu0 %289  ;;  %v293_v35 = vpop.xlane.xlu1 %292  ;;  %v367_v36 = vshra.s32 %v1612_v31, 16 }
 0x18e   :  { %vm334_vm4 = vcmp.eq.f32.partialorder %v1545_v33, %v290_v34  ;;  %vm335_vm5 = vcmp.eq.f32.partialorder %v1549_v37, %v293_v35 }
 0x18f   :  { %v350_v39 = vsel %vm334_vm4, %v1607_v28, 64  ;;  %v351_v40 = vsel %vm335_vm5, %v1607_v28, 64  ;;  %v1619_v41 = vcvt.s32.f32 %v367_v36 }
 0x190   :  { %v1622_v32 = vsel %vm284_vm2, %v350_v39, 2147483647  ;;  %v1625_v42 = vsel %vm284_vm2, %v351_v40, 2147483647 }
 0x191   :  { %v296_v45 = vpop.xlane.xlu1 %295  ;;  %v299_v46 = vpop.xlane.xlu0 %298  ;;  %370 = vmin.xlane.f32.xlu0 %v1619_v41  ;;  %v382_v33 = vshra.s32 %v1622_v32, 16  ;;  %v397_v37 = vshra.s32 %v1625_v42, 16 }
 0x192   :  { %vm336_vm6 = vcmp.eq.f32.partialorder %v1551_v38, %v296_v45  ;;  %vm337_vm7 = vcmp.eq.f32.partialorder %v1557_v43, %v299_v46 }
 0x193   :  { %v352_v47 = vsel %vm336_vm6, %v1607_v28, 64  ;;  %v353_v48 = vsel %vm337_vm7, %v1607_v28, 64  ;;  %v1634_v51 = vcvt.s32.f32 %v382_v33  ;;  %v1636_v52 = vcvt.s32.f32 %v397_v37 }
 0x194   :  { %v1639_v53 = vsel %vm284_vm2, %v352_v47, 2147483647  ;;  %v1642_v54 = vsel %vm284_vm2, %v353_v48, 2147483647 }
 0x195   :  { %v302_v57 = vpop.xlane.xlu1 %301  ;;  %v305_v58 = vpop.xlane.xlu0 %304  ;;  %385 = vmin.xlane.f32.xlu1 %v1634_v51  ;;  %400 = vmin.xlane.f32.xlu0 %v1636_v52  ;;  %v412_v38 = vshra.s32 %v1639_v53, 16  ;;  %v427_v43 = vshra.s32 %v1642_v54, 16 }
 0x196   :  { %vm338_vm8 = vcmp.eq.f32.partialorder %v1559_v44, %v302_v57  ;;  %vm339_vm9 = vcmp.eq.f32.partialorder %v1565_v49, %v305_v58 }
 0x197   :  { %v354_v59 = vsel %vm338_vm8, %v1607_v28, 64  ;;  %v355_v60 = vsel %vm339_vm9, %v1607_v28, 64  ;;  %v1652_v63 = vcvt.s32.f32 %v412_v38  ;;  %v1654_v0 = vcvt.s32.f32 %v427_v43 }
 0x198   :  { %v1657_v1 = vsel %vm284_vm2, %v354_v59, 2147483647  ;;  %v1660_v2 = vsel %vm284_vm2, %v355_v60, 2147483647 }
 0x199   :  { %v308_v5 = vpop.xlane.xlu1 %307  ;;  %v311_v6 = vpop.xlane.xlu0 %310  ;;  %415 = vmin.xlane.f32.xlu1 %v1652_v63  ;;  %430 = vmin.xlane.f32.xlu0 %v1654_v0  ;;  %v442_v44 = vshra.s32 %v1657_v1, 16  ;;  %v457_v49 = vshra.s32 %v1660_v2, 16 }
 0x19a   :  { %vm340_vm10 = vcmp.eq.f32.partialorder %v1567_v50, %v308_v5  ;;  %vm341_vm11 = vcmp.eq.f32.partialorder %v1573_v55, %v311_v6 }
 0x19b   :  { %v356_v8 = vsel %vm340_vm10, %v1607_v28, 64  ;;  %v357_v9 = vsel %vm341_vm11, %v1607_v28, 64  ;;  %v1670_v12 = vcvt.s32.f32 %v442_v44  ;;  %v1672_v13 = vcvt.s32.f32 %v457_v49 }
 0x19c   :  { %v1675_v25 = vsel %vm284_vm2, %v356_v8, 2147483647  ;;  %v1678_v27 = vsel %vm284_vm2, %v357_v9, 2147483647 }
 0x19d   :  { %v314_v30 = vpop.xlane.xlu1 %313  ;;  %v317_v29 = vpop.xlane.xlu0 %316  ;;  %445 = vmin.xlane.f32.xlu1 %v1670_v12  ;;  %460 = vmin.xlane.f32.xlu0 %v1672_v13  ;;  %v472_v50 = vshra.s32 %v1675_v25, 16  ;;  %v487_v55 = vshra.s32 %v1678_v27, 16 }
 0x19e   :  { %vm342_vm12 = vcmp.eq.f32.partialorder %v1575_v56, %v314_v30  ;;  %vm343_vm13 = vcmp.eq.f32.partialorder %v1581_v61, %v317_v29 }
 0x19f   :  { %v358_v34 = vsel %vm342_vm12, %v1607_v28, 64  ;;  %v359_v35 = vsel %vm343_vm13, %v1607_v28, 64  ;;  %v1688_v36 = vcvt.s32.f32 %v472_v50  ;;  %v1690_v39 = vcvt.s32.f32 %v487_v55 }
 0x1a0   :  { %v1693_v40 = vsel %vm284_vm2, %v358_v34, 2147483647  ;;  %v1696_v45 = vsel %vm284_vm2, %v359_v35, 2147483647 }
 0x1a1   :  { %v320_v46 = vpop.xlane.xlu1 %319  ;;  %v323_v33 = vpop.xlane.xlu0 %322  ;;  %475 = vmin.xlane.f32.xlu1 %v1688_v36  ;;  %490 = vmin.xlane.f32.xlu0 %v1690_v39  ;;  %v502_v56 = vshra.s32 %v1693_v40, 16  ;;  %v517_v61 = vshra.s32 %v1696_v45, 16 }
 0x1a2   :  { %vm344_vm14 = vcmp.eq.f32.partialorder %v1583_v62, %v320_v46  ;;  %vm345_vm15 = vcmp.eq.f32.partialorder %v1589_v3, %v323_v33 }
 0x1a3   :  { %v360_v37 = vsel %vm344_vm14, %v1607_v28, 64  ;;  %v361_v47 = vsel %vm345_vm15, %v1607_v28, 64  ;;  %v1706_v48 = vcvt.s32.f32 %v502_v56  ;;  %v1708_v57 = vcvt.s32.f32 %v517_v61 }
 0x1a4   :  { %v1711_v58 = vsel %vm284_vm2, %v360_v37, 2147483647  ;;  %v1714_v38 = vsel %vm284_vm2, %v361_v47, 2147483647  ;;  %v381_v56 = vand.u32 65535, %v1622_v32  ;;  %v396_v61 = vand.u32 65535, %v1625_v42 }
 0x1a5   :  { %v326_v43 = vpop.xlane.xlu1 %325  ;;  %505 = vmin.xlane.f32.xlu1 %v1706_v48  ;;  %520 = vmin.xlane.f32.xlu0 %v1708_v57  ;;  %v329_v62 = vpop.xlane.xlu0 %328  ;;  %v532_v3 = vshra.s32 %v1711_v58, 16  ;;  %v547_v59 = vshra.s32 %v1714_v38, 16 }
 0x1a6   :  { %vm346_vm1 = vcmp.eq.f32.partialorder %v1591_v4, %v326_v43  ;;  %vm347_vm3 = vcmp.eq.f32.partialorder %v1597_v10, %v329_v62  ;;  %v383_v62 = vcvt.s32.f32 %v381_v56 }
 0x1a7   :  { %v362_v60 = vsel %vm346_vm1, %v1607_v28, 64  ;;  %v363_v5 = vsel %vm347_vm3, %v1607_v28, 64  ;;  %v1724_v6 = vcvt.s32.f32 %v532_v3  ;;  %v1726_v44 = vcvt.s32.f32 %v547_v59 }
 0x1a8   :  { %v1729_v49 = vsel %vm284_vm2, %v362_v60, 2147483647  ;;  %v1732_v8 = vsel %vm284_vm2, %v363_v5, 2147483647  ;;  %v398_v3 = vcvt.s32.f32 %v396_v61  ;;  %v426_v59 = vand.u32 65535, %v1642_v54 }
 0x1a9   :  { %535 = vmin.xlane.f32.xlu1 %v1724_v6  ;;  %v332_v9 = vpop.xlane.xlu1 %331  ;;  %550 = vmin.xlane.f32.xlu0 %v1726_v44  ;;  %v562_v4 = vshra.s32 %v1729_v49, 16  ;;  %v577_v10 = vshra.s32 %v1732_v8, 16  ;;  %v456_v54 = vand.u32 65535, %v1660_v2  ;;  %v486_v2 = vand.u32 65535, %v1678_v27 }
 0x1aa   :  { %vm348_vm4 = vcmp.eq.f32.partialorder %v1599_v11, %v332_v9  ;;  %v366_v11 = vand.u32 65535, %v1612_v31  ;;  %v411_v31 = vand.u32 65535, %v1639_v53  ;;  %v428_v9 = vcvt.s32.f32 %v426_v59 }
 0x1ab   :  { %v364_v30 = vsel %vm348_vm4, %v1607_v28, 64  ;;  %v1740_v29 = vcvt.s32.f32 %v562_v4  ;;  %v1742_v50 = vcvt.s32.f32 %v577_v10  ;;  %v441_v53 = vand.u32 65535, %v1657_v1 }
 0x1ac   :  { %v1745_v55 = vsel %vm284_vm2, %v364_v30, 2147483647  ;;  %v368_v33 = vcvt.s32.f32 %v366_v11  ;;  %v413_v5 = vcvt.s32.f32 %v411_v31  ;;  %v471_v1 = vand.u32 65535, %v1675_v25 }
 0x1ad   :  { %565 = vmin.xlane.f32.xlu1 %v1740_v29  ;;  %580 = vmin.xlane.f32.xlu0 %v1742_v50  ;;  %v592_v34 = vshra.s32 %v1745_v55, 16  ;;  %v443_v30 = vcvt.s32.f32 %v441_v53  ;;  %v488_v61 = vcvt.s32.f32 %v486_v2  ;;  %v501_v25 = vand.u32 65535, %v1693_v40 }
 0x1ae   :  { %v473_v56 = vcvt.s32.f32 %v471_v1  ;;  %v516_v27 = vand.u32 65535, %v1696_v45  ;;  %v531_v40 = vand.u32 65535, %v1711_v58  ;;  %v546_v45 = vand.u32 65535, %v1714_v38 }
 0x1af   :  { %v1750_v35 = vcvt.s32.f32 %v592_v34  ;;  %v458_v34 = vcvt.s32.f32 %v456_v54  ;;  %v561_v58 = vand.u32 65535, %v1729_v49  ;;  %v576_v38 = vand.u32 65535, %v1732_v8 }
 0x1b0   :  { %v518_v31 = vcvt.s32.f32 %v516_v27  ;;  %v591_v49 = vand.u32 65535, %v1745_v55 }
 0x1b1   :  { %595 = vmin.xlane.f32.xlu1 %v1750_v35  ;;  %v563_v54 = vcvt.s32.f32 %v561_v58 }
 0x21e   :  { %v1754_v46 = vpop.xlane.xlu0 %370 }
 0x21f   :  { %vm372_vm5 = vcmp.eq.f32.partialorder %v1619_v41, %v1754_v46  ;;  %v377_v55 = vcvt.f32.s32 %v1754_v46 }
 0x220   :  { %v373_v37 = vsel %vm372_vm5, %v368_v33, inf }
 0x221   :  { %374 = vmin.xlane.f32.xlu0 %v373_v37  ;;  %v378_v1 = vshll.u32 %v377_v55, 16 }
 0x222   :  { %v1760_v47 = vpop.xlane.xlu1 %385  ;;  %v1762_v43 = vpop.xlane.xlu0 %400 }
 0x223   :  { %vm387_vm6 = vcmp.eq.f32.partialorder %v1634_v51, %v1760_v47  ;;  %vm402_vm7 = vcmp.eq.f32.partialorder %v1636_v52, %v1762_v43 }
 0x224   :  { %v388_v32 = vsel %vm387_vm6, %v383_v62, inf  ;;  %v403_v41 = vsel %vm402_vm7, %v398_v3, inf  ;;  %v503_v3 = vcvt.s32.f32 %v501_v25 }
 0x225   :  { %389 = vmin.xlane.f32.xlu1 %v388_v32  ;;  %404 = vmin.xlane.f32.xlu0 %v403_v41  ;;  %v533_v41 = vcvt.s32.f32 %v531_v40 }
 0x226   :  { %v1770_v42 = vpop.xlane.xlu1 %415  ;;  %v1772_v60 = vpop.xlane.xlu0 %430 }
 0x227   :  { %vm417_vm8 = vcmp.eq.f32.partialorder %v1652_v63, %v1770_v42  ;;  %vm432_vm9 = vcmp.eq.f32.partialorder %v1654_v0, %v1772_v60 }
 0x228   :  { %v418_v51 = vsel %vm417_vm8, %v413_v5, inf  ;;  %v433_v52 = vsel %vm432_vm9, %v428_v9, inf  ;;  %v548_v5 = vcvt.s32.f32 %v546_v45 }
 0x229   :  { %419 = vmin.xlane.f32.xlu1 %v418_v51  ;;  %434 = vmin.xlane.f32.xlu0 %v433_v52  ;;  %v578_v51 = vcvt.s32.f32 %v576_v38  ;;  %v593_v52 = vcvt.s32.f32 %v591_v49 }
 0x22a   :  { %v1780_v4 = vpop.xlane.xlu1 %445  ;;  %v1782_v10 = vpop.xlane.xlu0 %460 }
 0x22b   :  { %vm447_vm10 = vcmp.eq.f32.partialorder %v1670_v12, %v1780_v4  ;;  %vm462_vm11 = vcmp.eq.f32.partialorder %v1672_v13, %v1782_v10  ;;  %v452_v46 = vcvt.f32.s32 %v1780_v4 }
 0x22c   :  { %v448_v63 = vsel %vm447_vm10, %v443_v30, inf  ;;  %v463_v0 = vsel %vm462_vm11, %v458_v34, inf  ;;  %v392_v34 = vcvt.f32.s32 %v1760_v47  ;;  %v1364_v47 = vmov 0.0  }
 0x22d   :  { %449 = vmin.xlane.f32.xlu1 %v448_v63  ;;  %464 = vmin.xlane.f32.xlu0 %v463_v0  ;;  %v453_v4 = vshll.u32 %v452_v46, 16 }
 0x22e   :  { %v1790_v11 = vpop.xlane.xlu1 %475  ;;  %v1792_v33 = vpop.xlane.xlu0 %490  ;;  %v393_v0 = vshll.u32 %v392_v34, 16 }
 0x22f   :  { %vm477_vm12 = vcmp.eq.f32.partialorder %v1688_v36, %v1790_v11  ;;  %vm492_vm13 = vcmp.eq.f32.partialorder %v1690_v39, %v1792_v33  ;;  %v497_v49 = vcvt.f32.s32 %v1792_v33 }
 0x230   :  { %v478_v12 = vsel %vm477_vm12, %v473_v56, inf  ;;  %v493_v13 = vsel %vm492_vm13, %v488_v61, inf  ;;  %v422_v56 = vcvt.f32.s32 %v1770_v42  ;;  %v437_v61 = vcvt.f32.s32 %v1772_v60 }
 0x231   :  { %479 = vmin.xlane.f32.xlu1 %v478_v12  ;;  %494 = vmin.xlane.f32.xlu0 %v493_v13  ;;  %v467_v60 = vcvt.f32.s32 %v1782_v10 }
 0x232   :  { %v1800_v37 = vpop.xlane.xlu1 %505  ;;  %v1802_v62 = vpop.xlane.xlu0 %520  ;;  %v423_v40 = vshll.u32 %v422_v56, 16  ;;  %v438_v42 = vshll.u32 %v437_v61, 16  ;;  %v498_v56 = vshll.u32 %v497_v49, 16 }
 0x233   :  { %vm507_vm14 = vcmp.eq.f32.partialorder %v1706_v48, %v1800_v37  ;;  %vm522_vm15 = vcmp.eq.f32.partialorder %v1708_v57, %v1802_v62  ;;  %v512_v33 = vcvt.f32.s32 %v1800_v37  ;;  %v527_v61 = vcvt.f32.s32 %v1802_v62 }
 0x234   :  { %v508_v36 = vsel %vm507_vm14, %v503_v3, inf  ;;  %v523_v39 = vsel %vm522_vm15, %v518_v31, inf }
 0x235   :  { %509 = vmin.xlane.f32.xlu1 %v508_v36  ;;  %524 = vmin.xlane.f32.xlu0 %v523_v39 }
 0x236   :  { %v1810_v59 = vpop.xlane.xlu1 %535  ;;  %v1812_v32 = vpop.xlane.xlu0 %550 }
 0x237   :  { %vm537_vm1 = vcmp.eq.f32.partialorder %v1724_v6, %v1810_v59  ;;  %vm552_vm3 = vcmp.eq.f32.partialorder %v1726_v44, %v1812_v32  ;;  %v542_v37 = vcvt.f32.s32 %v1810_v59 }
 0x238   :  { %v538_v48 = vsel %vm537_vm1, %v533_v41, inf  ;;  %v553_v57 = vsel %vm552_vm3, %v548_v5, inf  ;;  %v482_v5 = vcvt.f32.s32 %v1790_v11 }
 0x239   :  { %539 = vmin.xlane.f32.xlu1 %v538_v48  ;;  %554 = vmin.xlane.f32.xlu0 %v553_v57 }
 0x23a   :  { %v1820_v9 = vpop.xlane.xlu1 %565  ;;  %v1822_v53 = vpop.xlane.xlu0 %580  ;;  %v483_v34 = vshll.u32 %v482_v5, 16 }
 0x23b   :  { %vm567_vm4 = vcmp.eq.f32.partialorder %v1740_v29, %v1820_v9  ;;  %vm582_vm5 = vcmp.eq.f32.partialorder %v1742_v50, %v1822_v53  ;;  %v407_v50 = vcvt.f32.s32 %v1762_v43 }
 0x23c   :  { %v568_v6 = vsel %vm567_vm4, %v563_v54, inf  ;;  %v583_v44 = vsel %vm582_vm5, %v578_v51, inf  ;;  %v468_v51 = vshll.u32 %v467_v60, 16 }
 0x23d   :  { %569 = vmin.xlane.f32.xlu1 %v568_v6  ;;  %584 = vmin.xlane.f32.xlu0 %v583_v44 }
 0x23e   :  { %v1829_v8 = vpop.xlane.xlu1 %595 }
 0x23f   :  { %vm597_vm6 = vcmp.eq.f32.partialorder %v1750_v35, %v1829_v8  ;;  %v408_v35 = vshll.u32 %v407_v50, 16 }
 0x240   :  { %v598_v30 = vsel %vm597_vm6, %v593_v52, inf }
 0x241   :  { %599 = vmin.xlane.f32.xlu1 %v598_v30 }
 0x2ae   :  { %v375_v29 = vpop.xlane.xlu0 %374 }
 0x2af   :  { %v376_v2 = vcvt.f32.s32 %v375_v29 }
 0x2b1   :  { %v379_v63 = vadd.s32 %v378_v1, %v376_v2 }
 0x2b2   :  { %v390_v25 = vpop.xlane.xlu1 %389  ;;  %v405_v27 = vpop.xlane.xlu0 %404 }
 0x2b3   :  { %v391_v12 = vcvt.f32.s32 %v390_v25  ;;  %v406_v13 = vcvt.f32.s32 %v405_v27  ;;  %vm605_vm7 = vcmp.eq.s32.totalorder %v1607_v28, %v379_v63 }
 0x2b4   :  { %v1133_v3 = vsel %vm605_vm7, 1.0, %v1364_v47 }
 0x2b5   :  { %v394_v43 = vadd.s32 %v393_v0, %v391_v12  ;;  %v409_v31 = vadd.s32 %v408_v35, %v406_v13  ;;  %1269 = vmatprep.mubr.msk.f32.mxu1 %vm284_vm2, %v1133_v3  ;;  %v1049_v48 = vsel %vm284_vm2, %v1133_v3, 0.0 }
 0x2b6   :  { %v420_v45 = vpop.xlane.xlu1 %419  ;;  %v435_v36 = vpop.xlane.xlu0 %434 }
 0x2b7   :  { %vm606_vm8 = vcmp.eq.s32.totalorder %v1607_v28, %v394_v43  ;;  %v421_v39 = vcvt.f32.s32 %v420_v45  ;;  %v436_v41 = vcvt.f32.s32 %v435_v36  ;;  %vm607_vm9 = vcmp.eq.s32.totalorder %v1607_v28, %v409_v31 }
 0x2b8   :  { %v1134_v58 = vsel %vm606_vm8, 1.0, %v1364_v47  ;;  %v1135_v38 = vsel %vm607_vm9, 1.0, %v1364_v47  ;;  %v513_v31 = vshll.u32 %v512_v33, 16  ;;  %v528_v45 = vshll.u32 %v527_v61, 16 }
 0x2b9   :  { %v1050_v57 = vsel %vm284_vm2, %v1134_v58, 0.0  ;;  %v424_v10 = vadd.s32 %v423_v40, %v421_v39  ;;  %v439_v54 = vadd.s32 %v438_v42, %v436_v41  ;;  %1270 = vmatmul.mubr.msk.f32.vlgmr.msra.gmra.mrb[0].mxu1 %vm284_vm2, %v1134_v58  ;;  %v1052_v11 = vsel %vm284_vm2, %v1135_v38, 0.0 }
 0x2ba   :  { %v1051_v6 = vadd.f32 %v1050_v57, %v1049_v48  ;;  %v450_v44 = vpop.xlane.xlu1 %449  ;;  %1272 = vmatprep.mubr.msk.f32.mxu1 %vm284_vm2, %v1135_v38  ;;  %v465_v52 = vpop.xlane.xlu0 %464  ;;  %v557_v36 = vcvt.f32.s32 %v1812_v32  ;;  %v543_v38 = vshll.u32 %v542_v37, 16  ;;  %v572_v32 = vcvt.f32.s32 %v1820_v9 }
 0x2bb   :  { %v451_v30 = vcvt.f32.s32 %v450_v44  ;;  %v466_v55 = vcvt.f32.s32 %v465_v52  ;;  %vm608_vm10 = vcmp.eq.s32.totalorder %v1607_v28, %v424_v10  ;;  %vm609_vm11 = vcmp.eq.s32.totalorder %v1607_v28, %v439_v54 }
 0x2bc   :  { %v1053_v29 = vadd.f32 %v1052_v11, %v1051_v6  ;;  %v1136_v1 = vsel %vm608_vm10, 1.0, %v1364_v47  ;;  %v1137_v50 = vsel %vm609_vm11, 1.0, %v1364_v47  ;;  %v558_v6 = vshll.u32 %v557_v36, 16 }
 0x2bd   :  { %v454_v2 = vadd.s32 %v453_v4, %v451_v30  ;;  %v469_v63 = vadd.s32 %v468_v51, %v466_v55  ;;  %1273 = vmatmul.mubr.msk.f32.gmra.mrb[2].mxu1 %vm284_vm2, %v1136_v1  ;;  %v1054_v0 = vsel %vm284_vm2, %v1136_v1, 0.0  ;;  %v1056_v35 = vsel %vm284_vm2, %v1137_v50, 0.0 }
 0x2be   :  { %v1055_v25 = vadd.f32 %v1054_v0, %v1053_v29  ;;  %v480_v27 = vpop.xlane.xlu1 %479  ;;  %1275 = vmatprep.mubr.msk.f32.mxu1 %vm284_vm2, %v1137_v50  ;;  %v495_v12 = vpop.xlane.xlu0 %494  ;;  %v587_v44 = vcvt.f32.s32 %v1822_v53  ;;  %v573_v33 = vshll.u32 %v572_v32, 16 }
 0x2bf   :  { %v481_v13 = vcvt.f32.s32 %v480_v27  ;;  %v496_v46 = vcvt.f32.s32 %v495_v12  ;;  %vm610_vm12 = vcmp.eq.s32.totalorder %v1607_v28, %v454_v2  ;;  %vm611_vm13 = vcmp.eq.s32.totalorder %v1607_v28, %v469_v63 }
 0x2c0   :  { %v1057_v3 = vadd.f32 %v1056_v35, %v1055_v25  ;;  %v1138_v43 = vsel %vm610_vm12, 1.0, %v1364_v47  ;;  %v1139_v62 = vsel %vm611_vm13, 1.0, %v1364_v47  ;;  %v588_v0 = vshll.u32 %v587_v44, 16 }
 0x2c1   :  { %v484_v40 = vadd.s32 %v483_v34, %v481_v13  ;;  %v499_v42 = vadd.s32 %v498_v56, %v496_v46  ;;  %1276 = vmatmul.mubr.msk.f32.gmra.mrb[4].mxu1 %vm284_vm2, %v1138_v43  ;;  %v1058_v60 = vsel %vm284_vm2, %v1138_v43, 0.0  ;;  %v1060_v59 = vsel %vm284_vm2, %v1139_v62, 0.0 }
 0x2c2   :  { %v1059_v39 = vadd.f32 %v1058_v60, %v1057_v3  ;;  %v510_v41 = vpop.xlane.xlu1 %509  ;;  %1278 = vmatprep.mubr.msk.f32.mxu1 %vm284_vm2, %v1139_v62  ;;  %v525_v4 = vpop.xlane.xlu0 %524  ;;  %v602_v56 = vcvt.f32.s32 %v1829_v8 }
 0x2c3   :  { %v511_v5 = vcvt.f32.s32 %v510_v41  ;;  %v526_v58 = vcvt.f32.s32 %v525_v4  ;;  %vm612_vm14 = vcmp.eq.s32.totalorder %v1607_v28, %v484_v40  ;;  %vm613_vm15 = vcmp.eq.s32.totalorder %v1607_v28, %v499_v42 }
 0x2c4   :  { %v1061_v48 = vadd.f32 %v1060_v59, %v1059_v39  ;;  %v1140_v57 = vsel %vm612_vm14, 1.0, %v1364_v47  ;;  %v1141_v10 = vsel %vm613_vm15, 1.0, %v1364_v47 }
 0x2c5   :  { %v514_v54 = vadd.s32 %v513_v31, %v511_v5  ;;  %v529_v51 = vadd.s32 %v528_v45, %v526_v58  ;;  %1279 = vmatmul.mubr.msk.f32.gmra.mrb[6].mxu1 %vm284_vm2, %v1140_v57  ;;  %v1062_v49 = vsel %vm284_vm2, %v1140_v57, 0.0  ;;  %v1064_v30 = vsel %vm284_vm2, %v1141_v10, 0.0 }
 0x2c6   :  { %v1063_v11 = vadd.f32 %v1062_v49, %v1061_v48  ;;  %v540_v52 = vpop.xlane.xlu1 %539  ;;  %1281 = vmatprep.mubr.msk.f32.mxu1 %vm284_vm2, %v1141_v10  ;;  %v555_v55 = vpop.xlane.xlu0 %554  ;;  %v603_v31 = vshll.u32 %v602_v56, 16 }
 0x2c7   :  { %v541_v34 = vcvt.f32.s32 %v540_v52  ;;  %v556_v29 = vcvt.f32.s32 %v555_v55  ;;  %vm614_vm1 = vcmp.eq.s32.totalorder %v1607_v28, %v514_v54  ;;  %vm615_vm3 = vcmp.eq.s32.totalorder %v1607_v28, %v529_v51 }
 0x2c8   :  { %v1065_v9 = vadd.f32 %v1064_v30, %v1063_v11  ;;  %v1142_v1 = vsel %vm614_vm1, 1.0, %v1364_v47  ;;  %v1143_v50 = vsel %vm615_vm3, 1.0, %v1364_v47 }
 0x2c9   :  { %v544_v53 = vadd.s32 %v543_v38, %v541_v34  ;;  %v559_v2 = vadd.s32 %v558_v6, %v556_v29  ;;  %1282 = vmatmul.mubr.msk.f32.gmra.mrb[8].mxu1 %vm284_vm2, %v1142_v1  ;;  %v1066_v63 = vsel %vm284_vm2, %v1142_v1, 0.0  ;;  %v1068_v27 = vsel %vm284_vm2, %v1143_v50, 0.0 }
 0x2ca   :  { %v1067_v61 = vadd.f32 %v1066_v63, %v1065_v9  ;;  %v570_v25 = vpop.xlane.xlu1 %569  ;;  %1284 = vmatprep.mubr.msk.f32.mxu1 %vm284_vm2, %v1143_v50  ;;  %v585_v35 = vpop.xlane.xlu0 %584 }
 0x2cb   :  { %v571_v12 = vcvt.f32.s32 %v570_v25  ;;  %v586_v13 = vcvt.f32.s32 %v585_v35  ;;  %vm616_vm4 = vcmp.eq.s32.totalorder %v1607_v28, %v544_v53  ;;  %vm617_vm5 = vcmp.eq.s32.totalorder %v1607_v28, %v559_v2 }
 0x2cc   :  { %v1069_v46 = vadd.f32 %v1068_v27, %v1067_v61  ;;  %v1144_v37 = vsel %vm616_vm4, 1.0, %v1364_v47  ;;  %v1145_v3 = vsel %vm617_vm5, 1.0, %v1364_v47 }
 0x2cd   :  { %v574_v43 = vadd.s32 %v573_v33, %v571_v12  ;;  %v589_v8 = vadd.s32 %v588_v0, %v586_v13  ;;  %1285 = vmatmul.mubr.msk.f32.gmra.mrb[10].mxu1 %vm284_vm2, %v1144_v37  ;;  %v1070_v62 = vsel %vm284_vm2, %v1144_v37, 0.0  ;;  %v1072_v45 = vsel %vm284_vm2, %v1145_v3, 0.0 }
 0x2ce   :  { %v1071_v40 = vadd.f32 %v1070_v62, %v1069_v46  ;;  %v600_v42 = vpop.xlane.xlu1 %599  ;;  %1287 = vmatprep.mubr.msk.f32.mxu1 %vm284_vm2, %v1145_v3 }
 0x2cf   :  { %v601_v60 = vcvt.f32.s32 %v600_v42  ;;  %vm618_vm6 = vcmp.eq.s32.totalorder %v1607_v28, %v574_v43  ;;  %vm619_vm7 = vcmp.eq.s32.totalorder %v1607_v28, %v589_v8 }
 0x2d0   :  { %v1073_v36 = vadd.f32 %v1072_v45, %v1071_v40  ;;  %v1146_v39 = vsel %vm618_vm6, 1.0, %v1364_v47  ;;  %v1147_v41 = vsel %vm619_vm7, 1.0, %v1364_v47 }
 0x2d1   :  { %v604_v59 = vadd.s32 %v603_v31, %v601_v60  ;;  %1288 = vmatmul.mubr.msk.f32.gmra.mrb[12].mxu1 %vm284_vm2, %v1146_v39  ;;  %v1074_v4 = vsel %vm284_vm2, %v1146_v39, 0.0  ;;  %v1076_v58 = vsel %vm284_vm2, %v1147_v41, 0.0 }
 0x2d2   :  { %v1075_v5 = vadd.f32 %v1074_v4, %v1073_v36  ;;  %1290 = vmatprep.mubr.msk.f32.mxu1 %vm284_vm2, %v1147_v41 }
 0x2d3   :  { %vm620_vm8 = vcmp.eq.s32.totalorder %v1607_v28, %v604_v59 }
 0x2d4   :  { %v1077_v38 = vadd.f32 %v1076_v58, %v1075_v5  ;;  %v1148_v48 = vsel %vm620_vm8, 1.0, %v1364_v47 }
 0x2d5   :  { %1291 = vmatmul.mubr.msk.f32.gmra.mrb[14].mxu1 %vm284_vm2, %v1148_v48  ;;  %v1078_v57 = vsel %vm284_vm2, %v1148_v48, 0.0 }
 0x2d6   :  { %v1913_v10 = vadd.f32 %v1078_v57, %v1077_v38 }
 0x38c   :  { %v1271_v32 = vpop.f32.mrb[0].mxu1 }
 0x38d   :  { %847 = vst.msk [vmem:[%s2035_s3 + $0x8] sm:$0xff] %vm42_vm0, %v1271_v32  ;;  %v914_v54 = vsub.f32 %v1271_v32, %v1447_v14  ;;  %v767_v28 = vpop.f32.mrb[1].mxu1 }
 0x38e   :  { %846 = vst.msk [vmem:[%s2035_s3] sm:$0xff] %vm42_vm0, %v767_v28  ;;  %v913_v47 = vsub.f32 %v767_v28, %v1414_v7 }
 0x38f   :  { %v978_v51 = vmul.f32 %v914_v54, %v914_v54 }
 0x390   :  { %v977_v49 = vmul.f32 %v913_v47, %v913_v47  ;;  %v1274_v6 = vpop.f32.mrb[2].mxu1 }
 0x391   :  { %v994_v44 = vsel %vm42_vm0, %v978_v51, 0.0  ;;  %849 = vst.msk [vmem:[%s2035_s3 + $0x18] sm:$0xff] %vm42_vm0, %v1274_v6  ;;  %v916_v14 = vsub.f32 %v1274_v6, %v1461_v16  ;;  %v777_v11 = vpop.f32.mrb[3].mxu1  ;;  %v1338_v51 = vld [vmem:[%s2032_s0 + $0x78] sm:$0xff] }
 0x392   :  { %v993_v52 = vsel %vm42_vm0, %v977_v49, 0.0  ;;  %848 = vst.msk [vmem:[%s2035_s3 + $0x10] sm:$0xff] %vm42_vm0, %v777_v11  ;;  %v915_v7 = vsub.f32 %v777_v11, %v1452_v15 }
 0x393   :  { %v995_v30 = vadd.f32 %v994_v44, %v993_v52  ;;  %v980_v55 = vmul.f32 %v916_v14, %v916_v14  ;;  %v1339_v14 = vld [vmem:[%s2032_s0 + $0x70] sm:$0xff] }
 0x394   :  { %v979_v34 = vmul.f32 %v915_v7, %v915_v7  ;;  %v1277_v29 = vpop.f32.mrb[4].mxu1 }
 0x395   :  { %851 = vst.msk [vmem:[%s2035_s3 + $0x28] sm:$0xff] %vm42_vm0, %v1277_v29  ;;  %v918_v16 = vsub.f32 %v1277_v29, %v1475_v18  ;;  %v787_v9 = vpop.f32.mrb[5].mxu1  ;;  %v998_v33 = vsel %vm42_vm0, %v980_v55, 0.0 }
 0x396   :  { %v996_v1 = vsel %vm42_vm0, %v979_v34, 0.0  ;;  %850 = vst.msk [vmem:[%s2035_s3 + $0x20] sm:$0xff] %vm42_vm0, %v787_v9  ;;  %v917_v15 = vsub.f32 %v787_v9, %v1466_v17 }
 0x397   :  { %v997_v50 = vadd.f32 %v996_v1, %v995_v30  ;;  %v982_v53 = vmul.f32 %v918_v16, %v918_v16 }
 0x398   :  { %v981_v2 = vmul.f32 %v917_v15, %v917_v15  ;;  %v1280_v63 = vpop.f32.mrb[6].mxu1 }
 0x399   :  { %v999_v0 = vadd.f32 %v998_v33, %v997_v50  ;;  %853 = vst.msk [vmem:[%s2035_s3 + $0x38] sm:$0xff] %vm42_vm0, %v1280_v63  ;;  %v920_v18 = vsub.f32 %v1280_v63, %v1489_v20  ;;  %v797_v56 = vpop.f32.mrb[7].mxu1  ;;  %v1002_v27 = vsel %vm42_vm0, %v982_v53, 0.0 }
 0x39a   :  { %v1000_v61 = vsel %vm42_vm0, %v981_v2, 0.0  ;;  %852 = vst.msk [vmem:[%s2035_s3 + $0x30] sm:$0xff] %vm42_vm0, %v797_v56  ;;  %v919_v17 = vsub.f32 %v797_v56, %v1480_v19 }
 0x39b   :  { %v1001_v25 = vadd.f32 %v1000_v61, %v999_v0  ;;  %v984_v35 = vmul.f32 %v920_v18, %v920_v18  ;;  %v1080_v18 = vrot.slane %v1913_v10, 4 }
 0x39c   :  { %v983_v12 = vmul.f32 %v919_v17, %v919_v17  ;;  %v1283_v13 = vpop.f32.mrb[8].mxu1 }
 0x39d   :  { %v1003_v46 = vadd.f32 %v1002_v27, %v1001_v25  ;;  %855 = vst.msk [vmem:[%s2035_s3 + $0x48] sm:$0xff] %vm42_vm0, %v1283_v13  ;;  %v922_v20 = vsub.f32 %v1283_v13, %v1503_v22  ;;  %v807_v37 = vpop.f32.mrb[9].mxu1  ;;  %v1006_v8 = vsel %vm42_vm0, %v984_v35, 0.0  ;;  %v1081_v56 = vadd.f32 %v1080_v18, %v1913_v10 }
 0x39e   :  { %v1004_v3 = vsel %vm42_vm0, %v983_v12, 0.0  ;;  %854 = vst.msk [vmem:[%s2035_s3 + $0x40] sm:$0xff] %vm42_vm0, %v807_v37  ;;  %v921_v19 = vsub.f32 %v807_v37, %v1494_v21 }
 0x39f   :  { %v1005_v43 = vadd.f32 %v1004_v3, %v1003_v46  ;;  %v986_v62 = vmul.f32 %v922_v20, %v922_v20  ;;  %v1082_v61 = vrot.slane %v1081_v56, 2 }
 0x3a0   :  { %v985_v31 = vmul.f32 %v921_v19, %v921_v19  ;;  %v1286_v40 = vpop.f32.mrb[10].mxu1 }
 0x3a1   :  { %v1007_v42 = vadd.f32 %v1006_v8, %v1005_v43  ;;  %857 = vst.msk [vmem:[%s2035_s3 + $0x58] sm:$0xff] %vm42_vm0, %v1286_v40  ;;  %v924_v22 = vsub.f32 %v1286_v40, %v1517_v24  ;;  %v817_v60 = vpop.f32.mrb[11].mxu1  ;;  %v1010_v39 = vsel %vm42_vm0, %v986_v62, 0.0  ;;  %v1083_v17 = vadd.f32 %v1082_v61, %v1081_v56 }
 0x3a2   :  { %v1008_v45 = vsel %vm42_vm0, %v985_v31, 0.0  ;;  %856 = vst.msk [vmem:[%s2035_s3 + $0x50] sm:$0xff] %vm42_vm0, %v817_v60  ;;  %v923_v21 = vsub.f32 %v817_v60, %v1508_v23  ;;  %v1337_v23 = vld [vmem:[%s2032_s0 + $0x60] sm:$0xff]  ;;  %s1365_s0 = smov [#allocation2]  }
 0x3a3   :  { %v1009_v36 = vadd.f32 %v1008_v45, %v1007_v42  ;;  %v988_v41 = vmul.f32 %v924_v22, %v924_v22  ;;  %v1084_v25 = vrot.slane %v1083_v17, 1 }
 0x3a4   :  { %v987_v59 = vmul.f32 %v923_v21, %v923_v21  ;;  %v1289_v4 = vpop.f32.mrb[12].mxu1 }
 0x3a5   :  { %v1011_v5 = vadd.f32 %v1010_v39, %v1009_v36  ;;  %859 = vst.msk [vmem:[%s2035_s3 + $0x68] sm:$0xff] %vm42_vm0, %v1289_v4  ;;  %v926_v24 = vsub.f32 %v1289_v4, %v1528_v26  ;;  %v827_v58 = vpop.f32.mrb[13].mxu1  ;;  %v1014_v32 = vsel %vm42_vm0, %v988_v41, 0.0  ;;  %v1085_v27 = vadd.f32 %v1084_v25, %v1083_v17 }
 0x3a6   :  { %v1012_v38 = vsel %vm42_vm0, %v987_v59, 0.0  ;;  %858 = vst.msk [vmem:[%s2035_s3 + $0x60] sm:$0xff] %vm42_vm0, %v827_v58  ;;  %v925_v48 = vsub.f32 %v827_v58, %v1337_v23 }
 0x3a7   :  { %v1013_v57 = vadd.f32 %v1012_v38, %v1011_v5  ;;  %v990_v54 = vmul.f32 %v926_v24, %v926_v24 }
 0x3a8   :  { %v989_v28 = vmul.f32 %v925_v48, %v925_v48  ;;  %v1292_v47 = vpop.f32.mrb[14].mxu1 }
 0x3a9   :  { %v1015_v26 = vadd.f32 %v1014_v32, %v1013_v57  ;;  %861 = vst.msk [vmem:[%s2035_s3 + $0x78] sm:$0xff] %vm42_vm0, %v1292_v47  ;;  %v928_v49 = vsub.f32 %v1292_v47, %v1338_v51  ;;  %v837_v6 = vpop.f32.mrb[15].mxu1  ;;  %v1018_v7 = vsel %vm42_vm0, %v990_v54, 0.0 }
 0x3aa   :  { %v1016_v44 = vsel %vm42_vm0, %v989_v28, 0.0  ;;  %860 = vst.msk [vmem:[%s2035_s3 + $0x70] sm:$0xff] %vm42_vm0, %v837_v6  ;;  %v927_v11 = vsub.f32 %v837_v6, %v1339_v14  ;;  %s1098_s3 = sshll.u32 %s1365_s0, 4  ;;  %s1099_s3 = int_to_ptr.vmem [resolvable:$true] %s1098_s3 }
 0x3ab   :  { %v1017_v52 = vadd.f32 %v1016_v44, %v1015_v26  ;;  %v992_v30 = vmul.f32 %v928_v49, %v928_v49  ;;  %s1340_s21 = scalar_lea.vmem %s1099_s3, 16  ;;  %s1344_s22 = scalar_lea.vmem %s1099_s3, 32 }
 0x3ac   :  { %v991_v55 = vmul.f32 %v927_v11, %v927_v11  ;;  %p1341_p0 = scmp.ne.s32.totalorder %s1099_s3, %s1340_s21  ;;  %p1345_p1 = scmp.lt.s32.totalorder %s1099_s3, %s1099_s3 }
 0x3ad   :  { %v1019_v34 = vadd.f32 %v1018_v7, %v1017_v52  ;;  %v1022_v9 = vsel %vm42_vm0, %v992_v30, 0.0  ;;  %p1346_p2 = scmp.lt.s32.totalorder %s1344_s22, %s1340_s21 }
 0x3ae   :  { %v1020_v29 = vsel %vm42_vm0, %v991_v55, 0.0 }
 0x3af   :  { %v1021_v16 = vadd.f32 %v1020_v29, %v1019_v34  ;;  %p1347_p3 = por %p1346_p2, %p1345_p1 }
 0x3b1   :  { %v1023_v1 = vadd.f32 %v1022_v9, %v1021_v16  ;;  %p1348_p4 = pnand %p1347_p3, %p1341_p0 }
 0x3b3   :  { %1024 = vadd.xlane.f32.xlu0 %v1023_v1 }
 0x440   :  { %v1025_v15 = vpop.xlane.xlu0 %1024 }
 0x441   :  { %v1026_v50 = vrot.slane %v1025_v15, 4 }
 0x443   :  { %v1027_v33 = vadd.f32 %v1026_v50, %v1025_v15 }
 0x445   :  { %v1028_v53 = vrot.slane %v1027_v33, 2 }
 0x447   :  { %v1029_v2 = vadd.f32 %v1028_v53, %v1027_v33 }
 0x449   :  { %v1030_v63 = vrot.slane %v1029_v2, 1 }
 0x44b   :  { %v1031_v0 = vadd.f32 %v1030_v63, %v1029_v2 }
 0x44d   :  { %1333 = vpush %v1031_v0 }
 0x47e   :  { %s1334_s20 = spop %1333 }
 0x47f   :  { %v1086_v35 = vstv %s1334_s20 }
 0x480   :  { %v1088_v12 = vsel %vm284_vm2, %v1085_v27, %v1086_v35 }
 0x481   :  { %1089 = vst [vmem:[#allocation2] sm:$0x1] %v1088_v12 }
 0x482   :  { %1351 = shalt.err (!%p1348_p4)
}
 0x483   :  { %s1352_s25 = scalar_lea.hbm %s2036_s4, 16 }
 0x484   :  { %p1353_p5 = scmp.ne.s32.totalorder %s2036_s4, %s1352_s25  ;;  %p1356_p6 = scmp.lt.u32.totalorder %s1352_s25, %s2036_s4 }
 0x486   :  { %p1358_p7 = pnand %p1356_p6, %p1353_p5 }
 0x488   :  { %1361 = shalt.err (!%p1358_p7)
}
 0x489   :  { %1101 = dma.vmem_to_hbm [thread:$0]  %s1099_s3, 16, %s2036_s4, [#allocation3]  }
 0x48a   :  { %1362 = dma.done.wait [#allocation3], 16  }
 0x48b   :  { %1363 = vsyncadd [#allocation3], 4294967280 }
 0x48c   :  { %1107 = vsyncpa [#allocation3], 1 }

</bundles_post_ra>
